<compile_context>
chip_gen: v7x
topology: tpu7x:2x2x1
jax: 0.10.0
libtpu: 0.0.40
codegen_flags: <defaults>
</compile_context>

<pallas_src>
import numpy as np
import jax
import jax.numpy as jnp
from jax import lax
from jax.experimental import pallas as pl
from jax.experimental.pallas import tpu as pltpu


# ----------------------------------------------------------------------------
# Constant-buffer construction (mirror of SinglePhoton_BS_Unitary, plain numpy)
# ----------------------------------------------------------------------------
def single_photon_bs_unitary(d1, d2, gate_impact):
    """cos/sin/id decomposition of the RBS unitary on the d1*d2 joint basis."""
    dim = d1 * d2
    id_matrix = np.eye(dim, dtype=np.float32)
    cos_matrix = np.zeros((dim, dim), dtype=np.float32)
    sin_matrix = np.zeros((dim, dim), dtype=np.float32)
    for state_1, state_2 in gate_impact:
        id_matrix[state_1, state_1] = 0.0
        id_matrix[state_2, state_2] = 0.0
        sin_matrix[state_1, state_1] = 1.0
        sin_matrix[state_2, state_2] = 1.0
        cos_matrix[state_1, state_2] = 1.0
        cos_matrix[state_2, state_1] = -1.0
    return cos_matrix, sin_matrix, id_matrix


# ----------------------------------------------------------------------------
# Pallas kernel: for each sample i of the (TB, d, d) block,
#   out[i] = U @ rho[i] @ U^T        (two NN MXU matmuls, f32 accumulation)
# U and U^T are resident in VMEM across the whole grid (constant index_map).
# ----------------------------------------------------------------------------
def _bs_registers_density_kernel(u_ref, ut_ref, rho_ref, o_ref):
    tb = rho_ref.shape[0]  # static batch-block size
    u = u_ref[...]
    ut = ut_ref[...]

    def body(i, carry):
        t = jnp.dot(u, rho_ref[i], preferred_element_type=jnp.float32)
        o_ref[i] = jnp.dot(t, ut, preferred_element_type=jnp.float32).astype(o_ref.dtype)
        return carry

    lax.fori_loop(0, tb, body, 0, unroll=True)


# ----------------------------------------------------------------------------
# Wrapper: accepts a single (d, d) density matrix or a batch (B, d, d)
# ----------------------------------------------------------------------------
def bs_registers_density_forward(cos_matrix, sin_matrix, id_matrix, angle, input_state,
                                 *, batch_block=8):
    """out[b] = U @ input_state[b] @ U.T with
       U = cos_matrix*cos(angle) + sin_matrix*sin(angle) + id_matrix."""
    d = cos_matrix.shape[0]
    rho = input_state
    squeeze = rho.ndim == 2
    if squeeze:
        rho = rho[None]
    B = rho.shape[0]

    # Hoisted U construction: two transcendentals + one tiny (d, d) VPU expression,
    # done once per call by XLA instead of once per grid step inside the kernel.
    ca = jnp.cos(angle).astype(jnp.float32)
    sa = jnp.sin(angle).astype(jnp.float32)
    u = (cos_matrix.astype(jnp.float32) * ca
         + sin_matrix.astype(jnp.float32) * sa
         + id_matrix.astype(jnp.float32))
    ut = u.T  # resident U^T so the second matmul is a plain NN dot (no XLU transpose)

    # Batch blocking: amortize per-grid-step overhead over TB samples, while keeping
    # at least 2 grid steps (when B >= 2) so both v7x TensorCores are used.
    if B >= 2:
        tb = max(1, min(batch_block, B // 2))
    else:
        tb = 1
    nb = pl.cdiv(B, tb)
    b_pad = nb * tb

    rho = rho.astype(jnp.float32)
    if b_pad != B:
        rho = jnp.pad(rho, ((0, b_pad - B), (0, 0), (0, 0)))

    out = pl.pallas_call(
        _bs_registers_density_kernel,
        out_shape=jax.ShapeDtypeStruct((b_pad, d, d), jnp.float32),
        grid_spec=pltpu.PrefetchScalarGridSpec(
            num_scalar_prefetch=0,
            grid=(nb,),
            in_specs=[
                pl.BlockSpec((d, d), lambda b: (0, 0)),        # U    (resident)
                pl.BlockSpec((d, d), lambda b: (0, 0)),        # U^T  (resident)
                pl.BlockSpec((tb, d, d), lambda b: (b, 0, 0)),  # rho block
            ],
            out_specs=pl.BlockSpec((tb, d, d), lambda b: (b, 0, 0)),
        ),
        compiler_params=pltpu.CompilerParams(
            dimension_semantics=("parallel",),
        ),
        cost_estimate=pl.CostEstimate(
            flops=4 * b_pad * d ** 3,                       # two (d,d,d) matmuls per sample
            transcendentals=0,
            bytes_accessed=(2 * d * d + 2 * b_pad * d * d) * 4,
        ),
    )(u, ut, rho)

    out = out[:B]
    return out[0] if squeeze else out


# ----------------------------------------------------------------------------
# Demo / correctness check
# ----------------------------------------------------------------------------
if __name__ == "__main__":
    # Module config: two registers with d1 and d2 modes -> d = d1*d2 joint basis states.
    d1, d2 = 8, 16
    d = d1 * d2                      # 128 (MXU/vreg aligned)
    batch = 8                        # blocked into (TB=4, d, d) tiles -> grid of 2

    # Deterministic gate_impact: an RBS between modes 0 and 1 of register 1 rotates
    # the joint basis states (0, k) <-> (1, k) for every mode k of register 2.
    gate_impact = [(0 * d2 + k, 1 * d2 + k) for k in range(d2)]
    cos_np, sin_np, id_np = single_photon_bs_unitary(d1, d2, gate_impact)
    cos_m = jnp.asarray(cos_np)
    sin_m = jnp.asarray(sin_np)
    id_m = jnp.asarray(id_np)

    key = jax.random.PRNGKey(0)
    k_angle, k_rho = jax.random.split(key)
    angle = jax.random.uniform(k_angle, (), dtype=jnp.float32)   # mimics torch.rand(())

    # Deterministic batch of PSD, unit-trace density matrices.
    A = jax.random.normal(k_rho, (batch, d, d), dtype=jnp.float32)
    rho_raw = jnp.einsum("bij,bkj->bik", A, A)
    tr = jnp.einsum("bii->b", rho_raw)
    rho = rho_raw / tr[:, None, None]

    fwd = jax.jit(bs_registers_density_forward)

    out = fwd(cos_m, sin_m, id_m, angle, rho)
    out = jax.block_until_ready(out)

    # float64 numpy reference.
    U64 = (cos_np.astype(np.float64) * np.cos(float(angle))
           + sin_np.astype(np.float64) * np.sin(float(angle))
           + id_np.astype(np.float64))
    rho64 = np.asarray(rho, dtype=np.float64)
    ref = np.matmul(np.matmul(U64, rho64), U64.T)

    assert out.shape == (batch, d, d)
    assert np.allclose(np.asarray(out), ref, atol=1e-4, rtol=1e-3), "batched mismatch vs reference"

    # Unbatched path (matches the module's single-density-matrix forward signature).
    out1 = fwd(cos_m, sin_m, id_m, angle, rho[0])
    out1 = jax.block_until_ready(out1)
    assert out1.shape == (d, d)
    assert np.allclose(np.asarray(out1), ref[0], atol=1e-4, rtol=1e-3), "unbatched mismatch vs reference"

    print("KERNEL_OK")
</pallas_src>

<mosaic_0001>
module attributes {stable_mosaic.version = 11 : i64} {
  func.func @_bs_registers_density_kernel(%arg0: i32, %arg1: memref<128x128xf32, #tpu.memory_space<vmem>>, %arg2: memref<128x128xf32, #tpu.memory_space<vmem>>, %arg3: memref<4x128x128xf32, #tpu.memory_space<vmem>>, %arg4: memref<4x128x128xf32, #tpu.memory_space<vmem>>) attributes {dimension_semantics = [#tpu.dimension_semantics<parallel>], iteration_bounds = array<i64: 2>, scalar_prefetch = 0 : i64, scratch_operands = 0 : i64, tpu.core_type = #tpu.core_type<tc>, window_params = [{pipeline_mode = #tpu.pipeline_mode<synchronous>, transform_indices = @transform_0, window_bounds = array<i64: 128, 128>}, {pipeline_mode = #tpu.pipeline_mode<synchronous>, transform_indices = @transform_1, window_bounds = array<i64: 128, 128>}, {transform_indices = @transform_2, window_bounds = array<i64: 4, 128, 128>}, {transform_indices = @transform_3, window_bounds = array<i64: 4, 128, 128>}]} {
    %c0 = arith.constant 0 : index
    %c0_0 = arith.constant 0 : index
    %0 = vector.load %arg1[%c0, %c0_0] : memref<128x128xf32, #tpu.memory_space<vmem>>, vector<128x128xf32>
    %c0_1 = arith.constant 0 : index
    %c0_2 = arith.constant 0 : index
    %1 = vector.load %arg2[%c0_1, %c0_2] : memref<128x128xf32, #tpu.memory_space<vmem>>, vector<128x128xf32>
    %c0_i32 = arith.constant 0 : i32
    %2 = arith.index_cast %c0_i32 : i32 to index
    %c0_3 = arith.constant 0 : index
    %c0_4 = arith.constant 0 : index
    %3 = vector.load %arg3[%2, %c0_3, %c0_4] : memref<4x128x128xf32, #tpu.memory_space<vmem>>, vector<1x128x128xf32>
    %4 = vector.shape_cast %3 : vector<1x128x128xf32> to vector<128x128xf32>
    %cst = arith.constant dense<0.000000e+00> : vector<128x128xf32>
    %5 = tpu.matmul %0, %4, %cst {dimension_numbers = #tpu.dot_dimension_numbers<[1], [0], [0], [1], [0, 0, 1, 1], [], []>} : vector<128x128xf32>, vector<128x128xf32>, vector<128x128xf32> -> vector<128x128xf32>
    %cst_5 = arith.constant dense<0.000000e+00> : vector<128x128xf32>
    %6 = tpu.matmul %5, %1, %cst_5 {dimension_numbers = #tpu.dot_dimension_numbers<[1], [0], [0], [1], [0, 0, 1, 1], [], []>} : vector<128x128xf32>, vector<128x128xf32>, vector<128x128xf32> -> vector<128x128xf32>
    %7 = arith.index_cast %c0_i32 : i32 to index
    %c0_6 = arith.constant 0 : index
    %c0_7 = arith.constant 0 : index
    %8 = vector.load %arg4[%7, %c0_6, %c0_7] : memref<4x128x128xf32, #tpu.memory_space<vmem>>, vector<1x128x128xf32>
    %9 = vector.shape_cast %8 : vector<1x128x128xf32> to vector<128x128xf32>
    %10 = vector.shape_cast %6 : vector<128x128xf32> to vector<1x128x128xf32>
    tpu.vector_store %arg4[%7, %c0_6, %c0_7], %10 {strides = array<i32>} : memref<4x128x128xf32, #tpu.memory_space<vmem>>, vector<1x128x128xf32>,
    %c1_i32 = arith.constant 1 : i32
    %11 = arith.index_cast %c1_i32 : i32 to index
    %c0_8 = arith.constant 0 : index
    %c0_9 = arith.constant 0 : index
    %12 = vector.load %arg3[%11, %c0_8, %c0_9] : memref<4x128x128xf32, #tpu.memory_space<vmem>>, vector<1x128x128xf32>
    %13 = vector.shape_cast %12 : vector<1x128x128xf32> to vector<128x128xf32>
    %cst_10 = arith.constant dense<0.000000e+00> : vector<128x128xf32>
    %14 = tpu.matmul %0, %13, %cst_10 {dimension_numbers = #tpu.dot_dimension_numbers<[1], [0], [0], [1], [0, 0, 1, 1], [], []>} : vector<128x128xf32>, vector<128x128xf32>, vector<128x128xf32> -> vector<128x128xf32>
    %cst_11 = arith.constant dense<0.000000e+00> : vector<128x128xf32>
    %15 = tpu.matmul %14, %1, %cst_11 {dimension_numbers = #tpu.dot_dimension_numbers<[1], [0], [0], [1], [0, 0, 1, 1], [], []>} : vector<128x128xf32>, vector<128x128xf32>, vector<128x128xf32> -> vector<128x128xf32>
    %16 = arith.index_cast %c1_i32 : i32 to index
    %c0_12 = arith.constant 0 : index
    %c0_13 = arith.constant 0 : index
    %17 = vector.load %arg4[%16, %c0_12, %c0_13] : memref<4x128x128xf32, #tpu.memory_space<vmem>>, vector<1x128x128xf32>
    %18 = vector.shape_cast %17 : vector<1x128x128xf32> to vector<128x128xf32>
    %19 = vector.shape_cast %15 : vector<128x128xf32> to vector<1x128x128xf32>
    tpu.vector_store %arg4[%16, %c0_12, %c0_13], %19 {strides = array<i32>} : memref<4x128x128xf32, #tpu.memory_space<vmem>>, vector<1x128x128xf32>,
    %c2_i32 = arith.constant 2 : i32
    %20 = arith.index_cast %c2_i32 : i32 to index
    %c0_14 = arith.constant 0 : index
    %c0_15 = arith.constant 0 : index
    %21 = vector.load %arg3[%20, %c0_14, %c0_15] : memref<4x128x128xf32, #tpu.memory_space<vmem>>, vector<1x128x128xf32>
    %22 = vector.shape_cast %21 : vector<1x128x128xf32> to vector<128x128xf32>
    %cst_16 = arith.constant dense<0.000000e+00> : vector<128x128xf32>
    %23 = tpu.matmul %0, %22, %cst_16 {dimension_numbers = #tpu.dot_dimension_numbers<[1], [0], [0], [1], [0, 0, 1, 1], [], []>} : vector<128x128xf32>, vector<128x128xf32>, vector<128x128xf32> -> vector<128x128xf32>
    %cst_17 = arith.constant dense<0.000000e+00> : vector<128x128xf32>
    %24 = tpu.matmul %23, %1, %cst_17 {dimension_numbers = #tpu.dot_dimension_numbers<[1], [0], [0], [1], [0, 0, 1, 1], [], []>} : vector<128x128xf32>, vector<128x128xf32>, vector<128x128xf32> -> vector<128x128xf32>
    %25 = arith.index_cast %c2_i32 : i32 to index
    %c0_18 = arith.constant 0 : index
    %c0_19 = arith.constant 0 : index
    %26 = vector.load %arg4[%25, %c0_18, %c0_19] : memref<4x128x128xf32, #tpu.memory_space<vmem>>, vector<1x128x128xf32>
    %27 = vector.shape_cast %26 : vector<1x128x128xf32> to vector<128x128xf32>
    %28 = vector.shape_cast %24 : vector<128x128xf32> to vector<1x128x128xf32>
    tpu.vector_store %arg4[%25, %c0_18, %c0_19], %28 {strides = array<i32>} : memref<4x128x128xf32, #tpu.memory_space<vmem>>, vector<1x128x128xf32>,
    %c3_i32 = arith.constant 3 : i32
    %29 = arith.index_cast %c3_i32 : i32 to index
    %c0_20 = arith.constant 0 : index
    %c0_21 = arith.constant 0 : index
    %30 = vector.load %arg3[%29, %c0_20, %c0_21] : memref<4x128x128xf32, #tpu.memory_space<vmem>>, vector<1x128x128xf32>
    %31 = vector.shape_cast %30 : vector<1x128x128xf32> to vector<128x128xf32>
    %cst_22 = arith.constant dense<0.000000e+00> : vector<128x128xf32>
    %32 = tpu.matmul %0, %31, %cst_22 {dimension_numbers = #tpu.dot_dimension_numbers<[1], [0], [0], [1], [0, 0, 1, 1], [], []>} : vector<128x128xf32>, vector<128x128xf32>, vector<128x128xf32> -> vector<128x128xf32>
    %cst_23 = arith.constant dense<0.000000e+00> : vector<128x128xf32>
    %33 = tpu.matmul %32, %1, %cst_23 {dimension_numbers = #tpu.dot_dimension_numbers<[1], [0], [0], [1], [0, 0, 1, 1], [], []>} : vector<128x128xf32>, vector<128x128xf32>, vector<128x128xf32> -> vector<128x128xf32>
    %34 = arith.index_cast %c3_i32 : i32 to index
    %c0_24 = arith.constant 0 : index
    %c0_25 = arith.constant 0 : index
    %35 = vector.load %arg4[%34, %c0_24, %c0_25] : memref<4x128x128xf32, #tpu.memory_space<vmem>>, vector<1x128x128xf32>
    %36 = vector.shape_cast %35 : vector<1x128x128xf32> to vector<128x128xf32>
    %37 = vector.shape_cast %33 : vector<128x128xf32> to vector<1x128x128xf32>
    tpu.vector_store %arg4[%34, %c0_24, %c0_25], %37 {strides = array<i32>} : memref<4x128x128xf32, #tpu.memory_space<vmem>>, vector<1x128x128xf32>,
    %c4_i32 = arith.constant 4 : i32
    return
  }
  func.func @transform_0(%arg0: i32) -> (i32, i32) {
    %c0_i32 = arith.constant 0 : i32
    %c0_i32_0 = arith.constant 0 : i32
    %c0_i32_1 = arith.constant 0 : i32
    return %c0_i32, %c0_i32_0 : i32, i32
  }
  func.func @transform_1(%arg0: i32) -> (i32, i32) {
    %c0_i32 = arith.constant 0 : i32
    %c0_i32_0 = arith.constant 0 : i32
    %c0_i32_1 = arith.constant 0 : i32
    return %c0_i32, %c0_i32_0 : i32, i32
  }
  func.func @transform_2(%arg0: i32) -> (i32, i32, i32) {
    %c0_i32 = arith.constant 0 : i32
    %c0_i32_0 = arith.constant 0 : i32
    %c0_i32_1 = arith.constant 0 : i32
    return %arg0, %c0_i32, %c0_i32_0 : i32, i32, i32
  }
  func.func @transform_3(%arg0: i32) -> (i32, i32, i32) {
    %c0_i32 = arith.constant 0 : i32
    %c0_i32_0 = arith.constant 0 : i32
    %c0_i32_1 = arith.constant 0 : i32
    return %arg0, %c0_i32, %c0_i32_0 : i32, i32, i32
  }
}

</mosaic_0001>

<bundles_post_ra>
// kernel: bs_registers_density_forward.1
= control target key start
LH: loop header
LB: loop body
LE: loop exit
PB: predicated region body
PF: predicated region fallthrough
CT: control target
= control target key end

     0   :  { %8 = vsyncpa [#allocation3], 0  ;;  %s3290_s0 = inlined_call_operand.vmem [shape: f32[128,128], index: 0, kind: input, shape index: {}]   ;;  %s3291_s1 = inlined_call_operand.vmem [shape: f32[128,128], index: 1, kind: input, shape index: {}]   ;;  %s3292_s2 = inlined_call_operand.vmem [shape: f32[8,128,128], index: 2, kind: input, shape index: {}]   ;;  %s3293_s3 = inlined_call_operand.hbm [shape: f32[8,128,128], index: 3, kind: output, shape index: {}]  }
   0x1   :  { %10 = vsyncpa [#allocation3 + $0x1], 0  ;;  %s2779_s12 = smov 0   ;;  %s2781_s13 = smov 0  }
   0x2   :  { %s2783_s14 = smov 0   ;;  %s2785_s15 = smov 0  }
   0x3 LB: > { %s2800_s16 = sadd.s32 4294967295, %s2754_s15   ;;  %s1578_s17 = sadd.s32 4294967294, %s2754_s15   ;;  %s2754_s15 = sphi %s2785_s15, %s3299_s15   ;;  %s2750_s14 = sphi %s2783_s14, %s3298_s14   ;;  %s2746_s13 = sphi %s2781_s13, %s3297_s13   ;;  %s2742_s12 = sphi %s2779_s12, %s3296_s12  }
   0x4   : > { %s2804_s18 = sadd.s32 1, %s2754_s15   ;;  %s91_s19 = sadd.s32 1, %s2750_s14 }
   0x5   : > { %s88_s20 = ssub.s32 %s2754_s15, %s2804_s18  ;;  %p101_p0 = scmp.ne.s32.totalorder %s2750_s14, %s2746_s13 }
   0x6   : > { %p89_p1 = scmp.eq.s32.totalorder %s88_s20, 0  ;;  %p102_p2 = scmp.eq.s32.totalorder %s2800_s16, 1 }
   0x7   : > { %p107_p3 = scmp.ne.s32.totalorder %s2746_s13, %s2742_s12  ;;  %p108_p4 = scmp.eq.s32.totalorder %s1578_s17, 1 }
   0x8   : > { %s2815_s21 = scalar_select %p89_p1, %s2750_s14, %s91_s19  }
   0x9   : > { %p2817_p5 = por %p102_p2, %p101_p0  ;;  %p2821_p6 = por %p108_p4, %p107_p3 }
   0xa   : > { %p1581_p7 = scmp.ge.s32.totalorder %s2754_s15, 1  ;;  %p142_p8 = scmp.lt.s32.totalorder %s2754_s15, 3 }
   0xc   : > { %p143_p9 = pnand %p1581_p7, %p142_p8 }
   0xd   : > { %s1583_s24 = sshll.u32 (!%p143_p9), %s2800_s16, 2  ;;  %v2831_v0 = vld [vmem:[%s3290_s0] sm:$0xff] (!%p143_p9)  ;;  %v192_v31 = vld [vmem:[%s3291_s1 + $0x8] sm:$0xff] (!%p143_p9)  ;;  %v193_v32 = vld [vmem:[%s3291_s1 + $0x10] sm:$0xff] (!%p143_p9)  ;;  %s1690_s26 = sshll.u32 (!%p143_p9), %s2800_s16, 13 }
   0xe   : > { %146 = sbr.rel (%p143_p9) target bundleno = 625 (0x271), region = 32  ;;  %p168_p10 = scmp.lt.s32.totalorder (!%p143_p9), %s1583_s24, 7  ;;  %1979 = vmatprep.mubr.f32.mxu0 (!%p143_p9), %v2831_v0  ;;  %v191_v30 = vld [vmem:[%s3291_s1] sm:$0xff] (!%p143_p9)  ;;  %v2871_v33 = vld [vmem:[%s3290_s0 + $0x8] sm:$0xff] (!%p143_p9)  ;;  %v194_v35 = vld [vmem:[%s3291_s1 + $0x18] sm:$0xff] (!%p143_p9) }
   0xf   : > { %v2873_v34 = vpack.c.bf16 (!%p143_p9), %v192_v31, %v191_v30  ;;  %v2881_v36 = vld [vmem:[%s3290_s0 + $0x10] sm:$0xff] (!%p143_p9)  ;;  %v2884_v39 = vpack.c.bf16 (!%p143_p9), %v194_v35, %v193_v32  ;;  %v195_v41 = vld [vmem:[%s3291_s1 + $0x20] sm:$0xff] (!%p143_p9)  ;;  %v196_v42 = vld [vmem:[%s3291_s1 + $0x28] sm:$0xff] (!%p143_p9)  ;;  %s3241_s4 = scalar_lea.hbm (!%p143_p9), %s3293_s3, %s1690_s26  ;;  %s2756_s6 = smov (!%p143_p9), [#allocation2]  }
  0x10   : > { %v2900_v43 = vld [vmem:[%s3290_s0 + $0x18] sm:$0xff] (!%p143_p9)  ;;  %v2905_v44 = vld [vmem:[%s3290_s0 + $0x20] sm:$0xff] (!%p143_p9)  ;;  %v2909_v47 = vpack.c.bf16 (!%p143_p9), %v196_v42, %v195_v41  ;;  %v197_v49 = vld [vmem:[%s3291_s1 + $0x30] sm:$0xff] (!%p143_p9)  ;;  %s2696_s7 = sshll.u32 (!%p143_p9), %s2756_s6, 4  ;;  %s2697_s7 = int_to_ptr.vmem [resolvable:$false] %s2696_s7 }
  0x11   : > { %2428 = vmatprep.subr.bf16.mxu1 (!%p143_p9), %v2873_v34  ;;  %v198_v50 = vld [vmem:[%s3291_s1 + $0x38] sm:$0xff] (!%p143_p9)  ;;  %v2924_v51 = vld [vmem:[%s3290_s0 + $0x28] sm:$0xff] (!%p143_p9)  ;;  %v2929_v52 = vld [vmem:[%s3290_s0 + $0x30] sm:$0xff] (!%p143_p9)  ;;  %s2698_s8 = scalar_lea.vmem (!%p143_p9), %s2697_s7, 16384 }
  0x12   : > { %2430 = vmatpush3.bf16.msra.mxu1 (!%p143_p9), %v2873_v34  ;;  %v2933_v55 = vpack.c.bf16 (!%p143_p9), %v198_v50, %v197_v49  ;;  %v199_v57 = vld [vmem:[%s3291_s1 + $0x40] sm:$0xff] (!%p143_p9)  ;;  %v200_v58 = vld [vmem:[%s3291_s1 + $0x48] sm:$0xff] (!%p143_p9)  ;;  %v2948_v59 = vld [vmem:[%s3290_s0 + $0x38] sm:$0xff] (!%p143_p9) }
  0x13   : > { %2432 = vmatprep.subr.bf16.mxu1 (!%p143_p9), %v2884_v39  ;;  %v2953_v60 = vld [vmem:[%s3290_s0 + $0x40] sm:$0xff] (!%p143_p9)  ;;  %v2957_v63 = vpack.c.bf16 (!%p143_p9), %v200_v58, %v199_v57 }
  0x15   : > { %s3301_s24 = smov (!%p168_p10, %s1583_s24), 7 }
  0x16   : > { %s1688_s27 = sshll.u32 %s3301_s24, 7  ;;  %2434 = vmatpush3.bf16.msra.mxu1 %v2884_v39 }
  0x17   : > { %s2837_s30 = scalar_lea.vmem %s3292_s2, %s1688_s27  ;;  %2436 = vmatprep.subr.bf16.mxu1 %v2909_v47 }
  0x18   : > { %v207_v1 = vld [vmem:[%s2837_s30] sm:$0xff]  ;;  %v208_v2 = vld [vmem:[%s2837_s30 + $0x8] sm:$0xff]  ;;  %v209_v3 = vld [vmem:[%s2837_s30 + $0x10] sm:$0xff] }
  0x19   : > { %v2395_v4 = vpack.c.bf16 %v208_v2, %v207_v1  ;;  %v210_v5 = vld [vmem:[%s2837_s30 + $0x18] sm:$0xff]  ;;  %v211_v7 = vld [vmem:[%s2837_s30 + $0x20] sm:$0xff]  ;;  %v212_v8 = vld [vmem:[%s2837_s30 + $0x28] sm:$0xff] }
  0x1a   : > { %v2399_v6 = vpack.c.bf16 %v210_v5, %v209_v3  ;;  %v2403_v9 = vpack.c.bf16 %v212_v8, %v211_v7  ;;  %v213_v10 = vld [vmem:[%s2837_s30 + $0x30] sm:$0xff]  ;;  %v214_v11 = vld [vmem:[%s2837_s30 + $0x38] sm:$0xff]  ;;  %v215_v13 = vld [vmem:[%s2837_s30 + $0x40] sm:$0xff]  ;;  %2438 = vmatpush3.bf16.msra.mxu1 %v2909_v47 }
  0x1b   : > { %2396 = vmatprep.subr.bf16.mxu0 %v2395_v4  ;;  %v2407_v12 = vpack.c.bf16 %v214_v11, %v213_v10  ;;  %v216_v14 = vld [vmem:[%s2837_s30 + $0x48] sm:$0xff]  ;;  %v217_v16 = vld [vmem:[%s2837_s30 + $0x50] sm:$0xff]  ;;  %v218_v17 = vld [vmem:[%s2837_s30 + $0x58] sm:$0xff]  ;;  %2440 = vmatprep.subr.bf16.mxu1 %v2933_v55 }
  0x1c   : > { %2398 = vmatpush3.bf16.msra.mxu0 %v2395_v4  ;;  %v2411_v15 = vpack.c.bf16 %v216_v14, %v215_v13  ;;  %v2415_v18 = vpack.c.bf16 %v218_v17, %v217_v16  ;;  %v219_v19 = vld [vmem:[%s2837_s30 + $0x60] sm:$0xff]  ;;  %v220_v20 = vld [vmem:[%s2837_s30 + $0x68] sm:$0xff]  ;;  %v221_v22 = vld [vmem:[%s2837_s30 + $0x70] sm:$0xff] }
  0x1d   : > { %2400 = vmatprep.subr.bf16.mxu0 %v2399_v6  ;;  %v2419_v21 = vpack.c.bf16 %v220_v20, %v219_v19  ;;  %v222_v23 = vld [vmem:[%s2837_s30 + $0x78] sm:$0xff]  ;;  %v1586_v25 = vld [vmem:[%s2837_s30 + $0x80] sm:$0xff]  ;;  %v1587_v26 = vld [vmem:[%s2837_s30 + $0x88] sm:$0xff] }
  0x1e   : > { %v2423_v24 = vpack.c.bf16 %v222_v23, %v221_v22  ;;  %v2459_v27 = vpack.c.bf16 %v1587_v26, %v1586_v25  ;;  %v1588_v28 = vld [vmem:[%s2837_s30 + $0x90] sm:$0xff]  ;;  %v1589_v29 = vld [vmem:[%s2837_s30 + $0x98] sm:$0xff]  ;;  %v1590_v38 = vld [vmem:[%s2837_s30 + $0xa0] sm:$0xff]  ;;  %2442 = vmatpush3.bf16.msra.mxu1 %v2933_v55 }
  0x1f   : > { %v2463_v37 = vpack.c.bf16 %v1589_v29, %v1588_v28  ;;  %v1591_v40 = vld [vmem:[%s2837_s30 + $0xa8] sm:$0xff]  ;;  %v1592_v46 = vld [vmem:[%s2837_s30 + $0xb0] sm:$0xff]  ;;  %v1593_v48 = vld [vmem:[%s2837_s30 + $0xb8] sm:$0xff]  ;;  %2444 = vmatprep.subr.bf16.mxu1 %v2957_v63 }
  0x20   : > { %2402 = vmatpush3.bf16.msra.mxu0 %v2399_v6  ;;  %v2467_v45 = vpack.c.bf16 %v1591_v40, %v1590_v38  ;;  %v2471_v53 = vpack.c.bf16 %v1593_v48, %v1592_v46  ;;  %v1594_v54 = vld [vmem:[%s2837_s30 + $0xc0] sm:$0xff]  ;;  %v1595_v56 = vld [vmem:[%s2837_s30 + $0xc8] sm:$0xff]  ;;  %v1596_v62 = vld [vmem:[%s2837_s30 + $0xd0] sm:$0xff] }
  0x21   : > { %2404 = vmatprep.subr.bf16.mxu0 %v2403_v9  ;;  %v2475_v61 = vpack.c.bf16 %v1595_v56, %v1594_v54  ;;  %v1597_v1 = vld [vmem:[%s2837_s30 + $0xd8] sm:$0xff]  ;;  %v201_v2 = vld [vmem:[%s3291_s1 + $0x50] sm:$0xff]  ;;  %v2972_v4 = vld [vmem:[%s3290_s0 + $0x48] sm:$0xff] }
  0x22   : > { %v202_v3 = vld [vmem:[%s3291_s1 + $0x58] sm:$0xff]  ;;  %v2977_v5 = vld [vmem:[%s3290_s0 + $0x50] sm:$0xff]  ;;  %v2479_v6 = vpack.c.bf16 %v1597_v1, %v1596_v62  ;;  %v1598_v7 = vld [vmem:[%s2837_s30 + $0xe0] sm:$0xff]  ;;  %2446 = vmatpush3.bf16.msra.mxu1 %v2957_v63 }
  0x23   : > { %v2981_v8 = vpack.c.bf16 %v202_v3, %v201_v2  ;;  %v203_v10 = vld [vmem:[%s3291_s1 + $0x60] sm:$0xff]  ;;  %v204_v11 = vld [vmem:[%s3291_s1 + $0x68] sm:$0xff]  ;;  %v1601_v17 = vld [vmem:[%s2837_s30 + $0xf8] sm:$0xff] }
  0x24   : > { %2406 = vmatpush3.bf16.msra.mxu0 %v2403_v9  ;;  %v1599_v9 = vld [vmem:[%s2837_s30 + $0xe8] sm:$0xff]  ;;  %v3001_v13 = vld [vmem:[%s3290_s0 + $0x60] sm:$0xff]  ;;  %v3005_v16 = vpack.c.bf16 %v204_v11, %v203_v10  ;;  %v206_v19 = vld [vmem:[%s3291_s1 + $0x78] sm:$0xff] }
  0x25   : > { %2408 = vmatprep.subr.bf16.mxu0 %v2407_v12  ;;  %v2483_v14 = vpack.c.bf16 %v1599_v9, %v1598_v7  ;;  %2448 = vmatprep.subr.bf16.mxu1 %v2981_v8  ;;  %v3020_v20 = vld [vmem:[%s3290_s0 + $0x68] sm:$0xff]  ;;  %v3038_v26 = vld [vmem:[%s3290_s0 + $0x78] sm:$0xff]  ;;  %v1620_v28 = vld [vmem:[%s2837_s30 + $0x110] sm:$0xff] }
  0x26   : > { %2450 = vmatpush3.bf16.msra.mxu1 %v2981_v8  ;;  %v1619_v25 = vld [vmem:[%s2837_s30 + $0x108] sm:$0xff]  ;;  %v1621_v29 = vld [vmem:[%s2837_s30 + $0x118] sm:$0xff]  ;;  %v1622_v31 = vld [vmem:[%s2837_s30 + $0x120] sm:$0xff] }
  0x27   : > { %2452 = vmatprep.subr.bf16.mxu1 %v3005_v16  ;;  %v2527_v30 = vpack.c.bf16 %v1621_v29, %v1620_v28  ;;  %v1623_v32 = vld [vmem:[%s2837_s30 + $0x128] sm:$0xff]  ;;  %v1625_v38 = vld [vmem:[%s2837_s30 + $0x138] sm:$0xff]  ;;  %v1626_v41 = vld [vmem:[%s2837_s30 + $0x140] sm:$0xff] }
  0x28   : > { %2410 = vmatpush3.bf16.msra.mxu0 %v2407_v12  ;;  %v2996_v12 = vld [vmem:[%s3290_s0 + $0x58] sm:$0xff]  ;;  %v2531_v35 = vpack.c.bf16 %v1623_v32, %v1622_v31  ;;  %v1627_v42 = vld [vmem:[%s2837_s30 + $0x148] sm:$0xff]  ;;  %v1628_v46 = vld [vmem:[%s2837_s30 + $0x150] sm:$0xff] }
  0x29   : > { %2412 = vmatprep.subr.bf16.mxu0 %v2411_v15  ;;  %v1629_v48 = vld [vmem:[%s2837_s30 + $0x158] sm:$0xff]  ;;  %v1630_v50 = vld [vmem:[%s2837_s30 + $0x160] sm:$0xff]  ;;  %v1632_v56 = vld [vmem:[%s2837_s30 + $0x170] sm:$0xff] }
  0x2a   : > { %2454 = vmatpush3.bf16.msra.mxu1 %v3005_v16  ;;  %v2543_v49 = vpack.c.bf16 %v1629_v48, %v1628_v46  ;;  %v1633_v57 = vld [vmem:[%s2837_s30 + $0x178] sm:$0xff]  ;;  %v1651_v62 = vld [vmem:[%s2837_s30 + $0x188] sm:$0xff]  ;;  %v1652_v2 = vld [vmem:[%s2837_s30 + $0x190] sm:$0xff] }
  0x2b   : > { %v2551_v58 = vpack.c.bf16 %v1633_v57, %v1632_v56  ;;  %v1653_v3 = vld [vmem:[%s2837_s30 + $0x198] sm:$0xff]  ;;  %v1654_v7 = vld [vmem:[%s2837_s30 + $0x1a0] sm:$0xff]  ;;  %v1655_v9 = vld [vmem:[%s2837_s30 + $0x1a8] sm:$0xff] }
  0x2c   : > { %2414 = vmatpush3.bf16.msra.mxu0 %v2411_v15  ;;  %v1600_v15 = vld [vmem:[%s2837_s30 + $0xf0] sm:$0xff]  ;;  %v2595_v10 = vpack.c.bf16 %v1655_v9, %v1654_v7  ;;  %v1663_v28 = vld [vmem:[%s2837_s30 + $0x1e8] sm:$0xff]  ;;  %v1665_v31 = vld [vmem:[%s2837_s30 + $0x1f8] sm:$0xff] }
  0x2d   : > { %2416 = vmatprep.subr.bf16.mxu0 %v2415_v18  ;;  %v2487_v22 = vpack.c.bf16 %v1601_v17, %v1600_v15  ;;  %v1656_v11 = vld [vmem:[%s2837_s30 + $0x1b0] sm:$0xff]  ;;  %v1658_v17 = vld [vmem:[%s2837_s30 + $0x1c0] sm:$0xff] }
  0x30   : > { %2418 = vmatpush3.bf16.msra.mxu0 %v2415_v18  ;;  %v205_v18 = vld [vmem:[%s3291_s1 + $0x70] sm:$0xff] }
  0x31   : > { %2420 = vmatprep.subr.bf16.mxu0 %v2419_v21  ;;  %v3028_v23 = vpack.c.bf16 %v206_v19, %v205_v18  ;;  %v1659_v18 = vld [vmem:[%s2837_s30 + $0x1c8] sm:$0xff] }
  0x32   : > { %v2603_v19 = vpack.c.bf16 %v1659_v18, %v1658_v17 }
  0x33   : > { %2456 = vmatprep.subr.bf16.mxu1 %v3028_v23 }
  0x34   : > { %2422 = vmatpush3.bf16.msra.mxu0 %v2419_v21  ;;  %v3025_v21 = vld [vmem:[%s3290_s0 + $0x70] sm:$0xff]  ;;  %2458 = vmatpush3.bf16.msra.mxu1 %v3028_v23 }
  0x35   : > { %2424 = vmatprep.subr.bf16.mxu0 %v2423_v24  ;;  %2492 = vmatprep.subr.bf16.mxu1 %v2873_v34 }
  0x38   : > { %2426 = vmatpush3.bf16.msra.mxu0 %v2423_v24  ;;  %v1618_v24 = vld [vmem:[%s2837_s30 + $0x100] sm:$0xff] }
  0x39   : > { %2460 = vmatprep.subr.bf16.mxu0 %v2459_v27 }
  0x3b   : > { %1980 = vmatmul.mubr.f32.vlgmr.msra.gmra.mrb[0].mxu0 %v2871_v33 }
  0x3c   : > { %2462 = vmatpush3.bf16.msra.mxu0 %v2459_v27  ;;  %1982 = vmatprep.mubr.f32.mxu0 %v2881_v36  ;;  %v2523_v27 = vpack.c.bf16 %v1619_v25, %v1618_v24  ;;  %v1661_v24 = vld [vmem:[%s2837_s30 + $0x1d8] sm:$0xff] }
  0x3d   : > { %2464 = vmatprep.subr.bf16.mxu0 %v2463_v37 }
  0x3f   : > { %1983 = vmatmul.mubr.f32.gmra.mrb[2].mxu0 %v2900_v43 }
  0x40   : > { %2466 = vmatpush3.bf16.msra.mxu0 %v2463_v37  ;;  %1985 = vmatprep.mubr.f32.mxu0 %v2905_v44  ;;  %v1624_v37 = vld [vmem:[%s2837_s30 + $0x130] sm:$0xff] }
  0x41   : > { %2468 = vmatprep.subr.bf16.mxu0 %v2467_v45  ;;  %v2535_v40 = vpack.c.bf16 %v1625_v38, %v1624_v37 }
  0x43   : > { %1986 = vmatmul.mubr.f32.gmra.mrb[4].mxu0 %v2924_v51 }
  0x44   : > { %2470 = vmatpush3.bf16.msra.mxu0 %v2467_v45  ;;  %1988 = vmatprep.mubr.f32.mxu0 %v2929_v52  ;;  %v2539_v45 = vpack.c.bf16 %v1627_v42, %v1626_v41 }
  0x45   : > { %2472 = vmatprep.subr.bf16.mxu0 %v2471_v53 }
  0x47   : > { %1989 = vmatmul.mubr.f32.gmra.mrb[6].mxu0 %v2948_v59 }
  0x48   : > { %2474 = vmatpush3.bf16.msra.mxu0 %v2471_v53  ;;  %1991 = vmatprep.mubr.f32.mxu0 %v2953_v60  ;;  %v1631_v53 = vld [vmem:[%s2837_s30 + $0x168] sm:$0xff] }
  0x49   : > { %2476 = vmatprep.subr.bf16.mxu0 %v2475_v61  ;;  %v2547_v54 = vpack.c.bf16 %v1631_v53, %v1630_v50 }
  0x4b   : > { %1992 = vmatmul.mubr.f32.gmra.mrb[8].mxu0 %v2972_v4 }
  0x4c   : > { %2478 = vmatpush3.bf16.msra.mxu0 %v2475_v61  ;;  %1994 = vmatprep.mubr.f32.mxu0 %v2977_v5  ;;  %v1650_v61 = vld [vmem:[%s2837_s30 + $0x180] sm:$0xff] }
  0x4d   : > { %2480 = vmatprep.subr.bf16.mxu0 %v2479_v6  ;;  %v2587_v1 = vpack.c.bf16 %v1651_v62, %v1650_v61 }
  0x4f   : > { %1995 = vmatmul.mubr.f32.gmra.mrb[10].mxu0 %v2996_v12 }
  0x50   : > { %2482 = vmatpush3.bf16.msra.mxu0 %v2479_v6  ;;  %1997 = vmatprep.mubr.f32.mxu0 %v3001_v13  ;;  %v2591_v6 = vpack.c.bf16 %v1653_v3, %v1652_v2 }
  0x51   : > { %2484 = vmatprep.subr.bf16.mxu0 %v2483_v14 }
  0x53   : > { %1998 = vmatmul.mubr.f32.gmra.mrb[12].mxu0 %v3020_v20 }
  0x54   : > { %2486 = vmatpush3.bf16.msra.mxu0 %v2483_v14  ;;  %2000 = vmatprep.mubr.f32.mxu0 %v3025_v21  ;;  %v1657_v14 = vld [vmem:[%s2837_s30 + $0x1b8] sm:$0xff] }
  0x55   : > { %2488 = vmatprep.subr.bf16.mxu0 %v2487_v22  ;;  %v2599_v15 = vpack.c.bf16 %v1657_v14, %v1656_v11 }
  0x57   : > { %2001 = vmatmul.mubr.f32.gmra.mrb[14].mxu0 %v3038_v26 }
  0x58   : > { %2490 = vmatpush3.bf16.msra.mxu0 %v2487_v22  ;;  %2091 = vmatprep.mubr.f32.mxu0 %v2831_v0  ;;  %v1660_v22 = vld [vmem:[%s2837_s30 + $0x1d0] sm:$0xff] }
  0x59   : > { %2524 = vmatprep.subr.bf16.mxu0 %v2523_v27  ;;  %v2607_v25 = vpack.c.bf16 %v1661_v24, %v1660_v22 }
  0x5b   : > { %2092 = vmatmul.mubr.f32.vlgmr.msra.gmra.mrb[16].mxu0 %v2871_v33 }
  0x5c   : > { %2526 = vmatpush3.bf16.msra.mxu0 %v2523_v27  ;;  %2094 = vmatprep.mubr.f32.mxu0 %v2881_v36  ;;  %v1662_v27 = vld [vmem:[%s2837_s30 + $0x1e0] sm:$0xff] }
  0x5d   : > { %2528 = vmatprep.subr.bf16.mxu0 %v2527_v30  ;;  %v2611_v29 = vpack.c.bf16 %v1663_v28, %v1662_v27 }
  0x5f   : > { %2095 = vmatmul.mubr.f32.gmra.mrb[18].mxu0 %v2900_v43 }
  0x60   : > { %2530 = vmatpush3.bf16.msra.mxu0 %v2527_v30  ;;  %2097 = vmatprep.mubr.f32.mxu0 %v2905_v44  ;;  %v1664_v30 = vld [vmem:[%s2837_s30 + $0x1f0] sm:$0xff]  ;;  %s164_s30 = sand.u32 1, %s2746_s13  }
  0x61   : > { %2532 = vmatprep.subr.bf16.mxu0 %v2531_v35  ;;  %v2615_v32 = vpack.c.bf16 %v1665_v31, %v1664_v30  ;;  %s1582_s24 = sshll.u32 %s164_s30, 9  ;;  %s3249_s16 = scalar_lea.sflag [#allocation3], %s164_s30 }
  0x62   : > { %s3172_s25 = scalar_lea.vmem [#allocation2], %s1582_s24 }
  0x63   : > { %2098 = vmatmul.mubr.f32.gmra.mrb[20].mxu0 %v2924_v51  ;;  %s1516_s27 = sshll.u32 %s3172_s25, 4  ;;  %s3243_s27 = int_to_ptr.vmem [resolvable:$true] %s1516_s27 }
  0x64   : > { %2534 = vmatpush3.bf16.msra.mxu0 %v2531_v35  ;;  %2100 = vmatprep.mubr.f32.mxu0 %v2929_v52  ;;  %s2692_s5 = scalar_lea.vmem %s3243_s27, 8192  ;;  %p2699_p0 = scmp.lt.s32.totalorder %s3243_s27, %s2697_s7 }
  0x65   : > { %2536 = vmatprep.subr.bf16.mxu0 %v2535_v40  ;;  %p2693_p11 = scmp.ne.s32.totalorder %s3243_s27, %s2692_s5  ;;  %p2700_p1 = scmp.lt.s32.totalorder %s2698_s8, %s2692_s5 }
  0x67   : > { %2101 = vmatmul.mubr.f32.gmra.mrb[22].mxu0 %v2948_v59  ;;  %p2694_p12 = pnand %p2693_p11, %p2817_p5  ;;  %p2701_p2 = por %p2700_p1, %p2699_p0 }
  0x68   : > { %2538 = vmatpush3.bf16.msra.mxu0 %v2535_v40  ;;  %2103 = vmatprep.mubr.f32.mxu0 %v2953_v60 }
  0x69   : > { %2540 = vmatprep.subr.bf16.mxu0 %v2539_v45  ;;  %p2695_p13 = pneg %p2694_p12 }
  0x6b   : > { %2104 = vmatmul.mubr.f32.gmra.mrb[24].mxu0 %v2972_v4  ;;  %p2702_p3 = pnand %p2701_p2, %p2695_p13 }
  0x6c   : > { %2542 = vmatpush3.bf16.msra.mxu0 %v2539_v45  ;;  %2106 = vmatprep.mubr.f32.mxu0 %v2977_v5 }
  0x6d   : > { %2544 = vmatprep.subr.bf16.mxu0 %v2543_v49 }
  0x6f   : > { %2107 = vmatmul.mubr.f32.gmra.mrb[26].mxu0 %v2996_v12 }
  0x70   : > { %2546 = vmatpush3.bf16.msra.mxu0 %v2543_v49  ;;  %2109 = vmatprep.mubr.f32.mxu0 %v3001_v13 }
  0x71   : > { %2548 = vmatprep.subr.bf16.mxu0 %v2547_v54 }
  0x73   : > { %2110 = vmatmul.mubr.f32.gmra.mrb[28].mxu0 %v3020_v20 }
  0x74   : > { %2550 = vmatpush3.bf16.msra.mxu0 %v2547_v54  ;;  %2112 = vmatprep.mubr.f32.mxu0 %v3025_v21 }
  0x75   : > { %2552 = vmatprep.subr.bf16.mxu0 %v2551_v58 }
  0x77   : > { %2113 = vmatmul.mubr.f32.gmra.mrb[30].mxu0 %v3038_v26 }
  0x78   : > { %2554 = vmatpush3.bf16.msra.mxu0 %v2551_v58  ;;  %2203 = vmatprep.mubr.f32.mxu0 %v2831_v0 }
  0x79   : > { %2588 = vmatprep.subr.bf16.mxu0 %v2587_v1 }
  0x7b   : > { %2204 = vmatmul.mubr.f32.vlgmr.msra.gmra.mrb[32].mxu0 %v2871_v33 }
  0x7c   : > { %2590 = vmatpush3.bf16.msra.mxu0 %v2587_v1  ;;  %2206 = vmatprep.mubr.f32.mxu0 %v2881_v36 }
  0x7d   : > { %2592 = vmatprep.subr.bf16.mxu0 %v2591_v6 }
  0x7f   : > { %2207 = vmatmul.mubr.f32.gmra.mrb[34].mxu0 %v2900_v43 }
  0x80   : > { %2594 = vmatpush3.bf16.msra.mxu0 %v2591_v6  ;;  %2209 = vmatprep.mubr.f32.mxu0 %v2905_v44 }
  0x81   : > { %2596 = vmatprep.subr.bf16.mxu0 %v2595_v10 }
  0x83   : > { %2210 = vmatmul.mubr.f32.gmra.mrb[36].mxu0 %v2924_v51 }
  0x84   : > { %2598 = vmatpush3.bf16.msra.mxu0 %v2595_v10  ;;  %2212 = vmatprep.mubr.f32.mxu0 %v2929_v52 }
  0x85   : > { %2600 = vmatprep.subr.bf16.mxu0 %v2599_v15 }
  0x87   : > { %2213 = vmatmul.mubr.f32.gmra.mrb[38].mxu0 %v2948_v59 }
  0x88   : > { %2602 = vmatpush3.bf16.msra.mxu0 %v2599_v15  ;;  %2215 = vmatprep.mubr.f32.mxu0 %v2953_v60 }
  0x89   : > { %2604 = vmatprep.subr.bf16.mxu0 %v2603_v19 }
  0x8b   : > { %2216 = vmatmul.mubr.f32.gmra.mrb[40].mxu0 %v2972_v4 }
  0x8c   : > { %2606 = vmatpush3.bf16.msra.mxu0 %v2603_v19  ;;  %2218 = vmatprep.mubr.f32.mxu0 %v2977_v5 }
  0x8d   : > { %2608 = vmatprep.subr.bf16.mxu0 %v2607_v25 }
  0x8f   : > { %2219 = vmatmul.mubr.f32.gmra.mrb[42].mxu0 %v2996_v12 }
  0x90   : > { %2610 = vmatpush3.bf16.msra.mxu0 %v2607_v25  ;;  %2221 = vmatprep.mubr.f32.mxu0 %v3001_v13 }
  0x91   : > { %2612 = vmatprep.subr.bf16.mxu0 %v2611_v29 }
  0x93   : > { %2222 = vmatmul.mubr.f32.gmra.mrb[44].mxu0 %v3020_v20 }
  0x94   : > { %2614 = vmatpush3.bf16.msra.mxu0 %v2611_v29  ;;  %2224 = vmatprep.mubr.f32.mxu0 %v3025_v21 }
  0x95   : > { %2616 = vmatprep.subr.bf16.mxu0 %v2615_v32 }
  0x97   : > { %2225 = vmatmul.mubr.f32.gmra.mrb[46].mxu0 %v3038_v26 }
  0x98   : > { %2618 = vmatpush3.bf16.msra.mxu0 %v2615_v32  ;;  %2315 = vmatprep.mubr.f32.mxu0 %v2831_v0 }
  0x9b   : > { %2316 = vmatmul.mubr.f32.vlgmr.msra.gmra.mrb[48].mxu0 %v2871_v33 }
  0x9c   : > { %2318 = vmatprep.mubr.f32.mxu0 %v2881_v36 }
  0x9f   : > { %2319 = vmatmul.mubr.f32.gmra.mrb[50].mxu0 %v2900_v43 }
  0xa0   : > { %2321 = vmatprep.mubr.f32.mxu0 %v2905_v44 }
  0xa3   : > { %2322 = vmatmul.mubr.f32.gmra.mrb[52].mxu0 %v2924_v51 }
  0xa4   : > { %2324 = vmatprep.mubr.f32.mxu0 %v2929_v52 }
  0xa7   : > { %2325 = vmatmul.mubr.f32.gmra.mrb[54].mxu0 %v2948_v59 }
  0xa8   : > { %2327 = vmatprep.mubr.f32.mxu0 %v2953_v60 }
  0xab   : > { %2328 = vmatmul.mubr.f32.gmra.mrb[56].mxu0 %v2972_v4 }
  0xac   : > { %2330 = vmatprep.mubr.f32.mxu0 %v2977_v5 }
  0xaf   : > { %2331 = vmatmul.mubr.f32.gmra.mrb[58].mxu0 %v2996_v12 }
  0xb0   : > { %2333 = vmatprep.mubr.f32.mxu0 %v3001_v13 }
  0xb3   : > { %2334 = vmatmul.mubr.f32.gmra.mrb[60].mxu0 %v3020_v20 }
  0xb4   : > { %2336 = vmatprep.mubr.f32.mxu0 %v3025_v21 }
  0xb7   : > { %2337 = vmatmul.mubr.f32.gmra.mrb[62].mxu0 %v3038_v26 }
 0x10e   : > { %v1981_v0 = vpop.f32.mrb[0].mxu0 }
 0x10f   : > { %v289_v33 = vpop.f32.mrb[1].mxu0 }
 0x110   : > { %2035 = vmatprep.mubr.f32.mxu1 %v289_v33 }
 0x111   : > { %2036 = vmatmul.mubr.f32.vlgmr.msra.gmra.mrb[0].mxu1 %v1981_v0 }
 0x112   : > { %v1984_v36 = vpop.f32.mrb[2].mxu0  ;;  %2494 = vmatpush3.bf16.msra.mxu1 %v2873_v34 }
 0x113   : > { %v299_v43 = vpop.f32.mrb[3].mxu0  ;;  %2496 = vmatprep.subr.bf16.mxu1 %v2884_v39 }
 0x114   : > { %2038 = vmatprep.mubr.f32.mxu1 %v299_v43 }
 0x115   : > { %2039 = vmatmul.mubr.f32.gmra.mrb[2].mxu1 %v1984_v36 }
 0x116   : > { %v1987_v44 = vpop.f32.mrb[4].mxu0  ;;  %2498 = vmatpush3.bf16.msra.mxu1 %v2884_v39 }
 0x117   : > { %v309_v51 = vpop.f32.mrb[5].mxu0  ;;  %2500 = vmatprep.subr.bf16.mxu1 %v2909_v47 }
 0x118   : > { %2041 = vmatprep.mubr.f32.mxu1 %v309_v51 }
 0x119   : > { %2042 = vmatmul.mubr.f32.gmra.mrb[4].mxu1 %v1987_v44 }
 0x11a   : > { %v1990_v52 = vpop.f32.mrb[6].mxu0  ;;  %2502 = vmatpush3.bf16.msra.mxu1 %v2909_v47 }
 0x11b   : > { %v319_v59 = vpop.f32.mrb[7].mxu0  ;;  %2504 = vmatprep.subr.bf16.mxu1 %v2933_v55 }
 0x11c   : > { %2044 = vmatprep.mubr.f32.mxu1 %v319_v59 }
 0x11d   : > { %2045 = vmatmul.mubr.f32.gmra.mrb[6].mxu1 %v1990_v52 }
 0x11e   : > { %v1993_v60 = vpop.f32.mrb[8].mxu0  ;;  %2506 = vmatpush3.bf16.msra.mxu1 %v2933_v55 }
 0x11f   : > { %v329_v4 = vpop.f32.mrb[9].mxu0  ;;  %2508 = vmatprep.subr.bf16.mxu1 %v2957_v63 }
 0x120   : > { %2047 = vmatprep.mubr.f32.mxu1 %v329_v4 }
 0x121   : > { %2048 = vmatmul.mubr.f32.gmra.mrb[8].mxu1 %v1993_v60 }
 0x122   : > { %v1996_v5 = vpop.f32.mrb[10].mxu0  ;;  %2510 = vmatpush3.bf16.msra.mxu1 %v2957_v63 }
 0x123   : > { %v339_v12 = vpop.f32.mrb[11].mxu0  ;;  %2512 = vmatprep.subr.bf16.mxu1 %v2981_v8 }
 0x124   : > { %2050 = vmatprep.mubr.f32.mxu1 %v339_v12 }
 0x125   : > { %2051 = vmatmul.mubr.f32.gmra.mrb[10].mxu1 %v1996_v5 }
 0x126   : > { %v1999_v13 = vpop.f32.mrb[12].mxu0  ;;  %2514 = vmatpush3.bf16.msra.mxu1 %v2981_v8 }
 0x127   : > { %v349_v20 = vpop.f32.mrb[13].mxu0  ;;  %2516 = vmatprep.subr.bf16.mxu1 %v3005_v16 }
 0x128   : > { %2053 = vmatprep.mubr.f32.mxu1 %v349_v20 }
 0x129   : > { %2054 = vmatmul.mubr.f32.gmra.mrb[12].mxu1 %v1999_v13 }
 0x12a   : > { %v2002_v21 = vpop.f32.mrb[14].mxu0  ;;  %2518 = vmatpush3.bf16.msra.mxu1 %v3005_v16 }
 0x12b   : > { %v359_v26 = vpop.f32.mrb[15].mxu0  ;;  %2520 = vmatprep.subr.bf16.mxu1 %v3028_v23 }
 0x12c   : > { %2056 = vmatprep.mubr.f32.mxu1 %v359_v26 }
 0x12d   : > { %2057 = vmatmul.mubr.f32.gmra.mrb[14].mxu1 %v2002_v21 }
 0x12e   : > { %v2093_v35 = vpop.f32.mrb[16].mxu0  ;;  %2522 = vmatpush3.bf16.msra.mxu1 %v3028_v23 }
 0x12f   : > { %v612_v37 = vpop.f32.mrb[17].mxu0  ;;  %2556 = vmatprep.subr.bf16.mxu1 %v2873_v34 }
 0x130   : > { %2147 = vmatprep.mubr.f32.mxu1 %v612_v37 }
 0x131   : > { %2148 = vmatmul.mubr.f32.vlgmr.msra.gmra.mrb[16].mxu1 %v2093_v35 }
 0x132   : > { %v2096_v38 = vpop.f32.mrb[18].mxu0  ;;  %2558 = vmatpush3.bf16.msra.mxu1 %v2873_v34 }
 0x133   : > { %v622_v40 = vpop.f32.mrb[19].mxu0  ;;  %2560 = vmatprep.subr.bf16.mxu1 %v2884_v39 }
 0x134   : > { %2150 = vmatprep.mubr.f32.mxu1 %v622_v40 }
 0x135   : > { %2151 = vmatmul.mubr.f32.gmra.mrb[18].mxu1 %v2096_v38 }
 0x136   : > { %v2099_v41 = vpop.f32.mrb[20].mxu0  ;;  %2562 = vmatpush3.bf16.msra.mxu1 %v2884_v39 }
 0x137   : > { %v632_v42 = vpop.f32.mrb[21].mxu0  ;;  %2564 = vmatprep.subr.bf16.mxu1 %v2909_v47 }
 0x138   : > { %2153 = vmatprep.mubr.f32.mxu1 %v632_v42 }
 0x139   : > { %2154 = vmatmul.mubr.f32.gmra.mrb[20].mxu1 %v2099_v41 }
 0x13a   : > { %v2102_v45 = vpop.f32.mrb[22].mxu0  ;;  %2566 = vmatpush3.bf16.msra.mxu1 %v2909_v47 }
 0x13b   : > { %v642_v46 = vpop.f32.mrb[23].mxu0  ;;  %2568 = vmatprep.subr.bf16.mxu1 %v2933_v55 }
 0x13c   : > { %2156 = vmatprep.mubr.f32.mxu1 %v642_v46 }
 0x13d   : > { %2157 = vmatmul.mubr.f32.gmra.mrb[22].mxu1 %v2102_v45 }
 0x13e   : > { %v2105_v48 = vpop.f32.mrb[24].mxu0  ;;  %2570 = vmatpush3.bf16.msra.mxu1 %v2933_v55 }
 0x13f   : > { %v652_v49 = vpop.f32.mrb[25].mxu0  ;;  %2572 = vmatprep.subr.bf16.mxu1 %v2957_v63 }
 0x140   : > { %2159 = vmatprep.mubr.f32.mxu1 %v652_v49 }
 0x141   : > { %2160 = vmatmul.mubr.f32.gmra.mrb[24].mxu1 %v2105_v48 }
 0x142   : > { %v2108_v50 = vpop.f32.mrb[26].mxu0  ;;  %2574 = vmatpush3.bf16.msra.mxu1 %v2957_v63 }
 0x143   : > { %v662_v53 = vpop.f32.mrb[27].mxu0  ;;  %2576 = vmatprep.subr.bf16.mxu1 %v2981_v8 }
 0x144   : > { %2162 = vmatprep.mubr.f32.mxu1 %v662_v53 }
 0x145   : > { %2163 = vmatmul.mubr.f32.gmra.mrb[26].mxu1 %v2108_v50 }
 0x146   : > { %v2111_v54 = vpop.f32.mrb[28].mxu0  ;;  %2578 = vmatpush3.bf16.msra.mxu1 %v2981_v8 }
 0x147   : > { %v672_v56 = vpop.f32.mrb[29].mxu0  ;;  %2580 = vmatprep.subr.bf16.mxu1 %v3005_v16 }
 0x148   : > { %2165 = vmatprep.mubr.f32.mxu1 %v672_v56 }
 0x149   : > { %2166 = vmatmul.mubr.f32.gmra.mrb[28].mxu1 %v2111_v54 }
 0x14a   : > { %v2114_v57 = vpop.f32.mrb[30].mxu0  ;;  %2582 = vmatpush3.bf16.msra.mxu1 %v3005_v16 }
 0x14b   : > { %v682_v58 = vpop.f32.mrb[31].mxu0  ;;  %2584 = vmatprep.subr.bf16.mxu1 %v3028_v23 }
 0x14c   : > { %2168 = vmatprep.mubr.f32.mxu1 %v682_v58 }
 0x14d   : > { %2169 = vmatmul.mubr.f32.gmra.mrb[30].mxu1 %v2114_v57 }
 0x14e   : > { %v2205_v61 = vpop.f32.mrb[32].mxu0  ;;  %2586 = vmatpush3.bf16.msra.mxu1 %v3028_v23 }
 0x14f   : > { %v936_v62 = vpop.f32.mrb[33].mxu0  ;;  %2620 = vmatprep.subr.bf16.mxu1 %v2873_v34 }
 0x150   : > { %2259 = vmatprep.mubr.f32.mxu1 %v936_v62 }
 0x151   : > { %2260 = vmatmul.mubr.f32.vlgmr.msra.gmra.mrb[32].mxu1 %v2205_v61 }
 0x152   : > { %v2208_v1 = vpop.f32.mrb[34].mxu0  ;;  %2622 = vmatpush3.bf16.msra.mxu1 %v2873_v34 }
 0x153   : > { %v946_v2 = vpop.f32.mrb[35].mxu0  ;;  %2624 = vmatprep.subr.bf16.mxu1 %v2884_v39 }
 0x154   : > { %2262 = vmatprep.mubr.f32.mxu1 %v946_v2 }
 0x155   : > { %2263 = vmatmul.mubr.f32.gmra.mrb[34].mxu1 %v2208_v1 }
 0x156   : > { %v2211_v3 = vpop.f32.mrb[36].mxu0  ;;  %2626 = vmatpush3.bf16.msra.mxu1 %v2884_v39 }
 0x157   : > { %v956_v6 = vpop.f32.mrb[37].mxu0  ;;  %2628 = vmatprep.subr.bf16.mxu1 %v2909_v47 }
 0x158   : > { %2265 = vmatprep.mubr.f32.mxu1 %v956_v6 }
 0x159   : > { %2266 = vmatmul.mubr.f32.gmra.mrb[36].mxu1 %v2211_v3 }
 0x15a   : > { %v2214_v7 = vpop.f32.mrb[38].mxu0  ;;  %2630 = vmatpush3.bf16.msra.mxu1 %v2909_v47 }
 0x15b   : > { %v966_v9 = vpop.f32.mrb[39].mxu0  ;;  %2632 = vmatprep.subr.bf16.mxu1 %v2933_v55 }
 0x15c   : > { %2268 = vmatprep.mubr.f32.mxu1 %v966_v9 }
 0x15d   : > { %2269 = vmatmul.mubr.f32.gmra.mrb[38].mxu1 %v2214_v7 }
 0x15e   : > { %v2217_v34 = vpop.f32.mrb[40].mxu0  ;;  %2634 = vmatpush3.bf16.msra.mxu1 %v2933_v55 }
 0x15f   : > { %v976_v10 = vpop.f32.mrb[41].mxu0  ;;  %2636 = vmatprep.subr.bf16.mxu1 %v2957_v63 }
 0x160   : > { %2271 = vmatprep.mubr.f32.mxu1 %v976_v10 }
 0x161   : > { %2272 = vmatmul.mubr.f32.gmra.mrb[40].mxu1 %v2217_v34 }
 0x162   : > { %v2220_v39 = vpop.f32.mrb[42].mxu0  ;;  %2638 = vmatpush3.bf16.msra.mxu1 %v2957_v63 }
 0x163   : > { %v986_v11 = vpop.f32.mrb[43].mxu0  ;;  %2640 = vmatprep.subr.bf16.mxu1 %v2981_v8 }
 0x164   : > { %2274 = vmatprep.mubr.f32.mxu1 %v986_v11 }
 0x165   : > { %2275 = vmatmul.mubr.f32.gmra.mrb[42].mxu1 %v2220_v39 }
 0x166   : > { %v2223_v47 = vpop.f32.mrb[44].mxu0  ;;  %2642 = vmatpush3.bf16.msra.mxu1 %v2981_v8 }
 0x167   : > { %v996_v14 = vpop.f32.mrb[45].mxu0  ;;  %2644 = vmatprep.subr.bf16.mxu1 %v3005_v16 }
 0x168   : > { %2277 = vmatprep.mubr.f32.mxu1 %v996_v14 }
 0x169   : > { %2278 = vmatmul.mubr.f32.gmra.mrb[44].mxu1 %v2223_v47 }
 0x16a   : > { %v2226_v55 = vpop.f32.mrb[46].mxu0  ;;  %2646 = vmatpush3.bf16.msra.mxu1 %v3005_v16 }
 0x16b   : > { %v1006_v15 = vpop.f32.mrb[47].mxu0  ;;  %2648 = vmatprep.subr.bf16.mxu1 %v3028_v23 }
 0x16c   : > { %2280 = vmatprep.mubr.f32.mxu1 %v1006_v15 }
 0x16d   : > { %2281 = vmatmul.mubr.f32.gmra.mrb[46].mxu1 %v2226_v55 }
 0x16e   : > { %v2317_v63 = vpop.f32.mrb[48].mxu0  ;;  %2650 = vmatpush3.bf16.msra.mxu1 %v3028_v23 }
 0x16f   : > { %v1260_v17 = vpop.f32.mrb[49].mxu0 }
 0x170   : > { %2371 = vmatprep.mubr.f32.mxu1 %v1260_v17 }
 0x171   : > { %2372 = vmatmul.mubr.f32.vlgmr.msra.gmra.mrb[48].mxu1 %v2317_v63 }
 0x172   : > { %v2320_v8 = vpop.f32.mrb[50].mxu0 }
 0x173   : > { %v1270_v18 = vpop.f32.mrb[51].mxu0 }
 0x174   : > { %2374 = vmatprep.mubr.f32.mxu1 %v1270_v18 }
 0x175   : > { %2375 = vmatmul.mubr.f32.gmra.mrb[50].mxu1 %v2320_v8 }
 0x176   : > { %v2323_v19 = vpop.f32.mrb[52].mxu0 }
 0x177   : > { %v1280_v22 = vpop.f32.mrb[53].mxu0 }
 0x178   : > { %2377 = vmatprep.mubr.f32.mxu1 %v1280_v22 }
 0x179   : > { %2378 = vmatmul.mubr.f32.gmra.mrb[52].mxu1 %v2323_v19 }
 0x17a   : > { %v2326_v16 = vpop.f32.mrb[54].mxu0 }
 0x17b   : > { %v1290_v24 = vpop.f32.mrb[55].mxu0 }
 0x17c   : > { %2380 = vmatprep.mubr.f32.mxu1 %v1290_v24 }
 0x17d   : > { %2381 = vmatmul.mubr.f32.gmra.mrb[54].mxu1 %v2326_v16 }
 0x17e   : > { %v2329_v25 = vpop.f32.mrb[56].mxu0 }
 0x17f   : > { %v1300_v27 = vpop.f32.mrb[57].mxu0 }
 0x180   : > { %2383 = vmatprep.mubr.f32.mxu1 %v1300_v27 }
 0x181   : > { %2384 = vmatmul.mubr.f32.gmra.mrb[56].mxu1 %v2329_v25 }
 0x182   : > { %v2332_v23 = vpop.f32.mrb[58].mxu0 }
 0x183   : > { %v1310_v28 = vpop.f32.mrb[59].mxu0 }
 0x184   : > { %2386 = vmatprep.mubr.f32.mxu1 %v1310_v28 }
 0x185   : > { %2387 = vmatmul.mubr.f32.gmra.mrb[58].mxu1 %v2332_v23 }
 0x186   : > { %v2335_v29 = vpop.f32.mrb[60].mxu0 }
 0x187   : > { %v1320_v30 = vpop.f32.mrb[61].mxu0 }
 0x188   : > { %2389 = vmatprep.mubr.f32.mxu1 %v1320_v30 }
 0x189   : > { %2390 = vmatmul.mubr.f32.gmra.mrb[60].mxu1 %v2335_v29 }
 0x18a   : > { %v2338_v31 = vpop.f32.mrb[62].mxu0 }
 0x18b   : > { %v1330_v32 = vpop.f32.mrb[63].mxu0 }
 0x18c   : > { %2392 = vmatprep.mubr.f32.mxu1 %v1330_v32 }
 0x18d   : > { %2393 = vmatmul.mubr.f32.gmra.mrb[62].mxu1 %v2338_v31 }
 0x1e4   : > { %v2037_v0 = vpop.f32.mrb[0].mxu1 }
 0x1e5   : > { %514 = vst [vmem:[%s3172_s25 + $0x8] sm:$0xff] %v2037_v0  ;;  %v434_v33 = vpop.f32.mrb[1].mxu1 }
 0x1e6   : > { %513 = vst [vmem:[%s3172_s25] sm:$0xff] %v434_v33 }
 0x1e8   : > { %v2040_v36 = vpop.f32.mrb[2].mxu1 }
 0x1e9   : > { %516 = vst [vmem:[%s3172_s25 + $0x18] sm:$0xff] %v2040_v36  ;;  %v444_v43 = vpop.f32.mrb[3].mxu1 }
 0x1ea   : > { %515 = vst [vmem:[%s3172_s25 + $0x10] sm:$0xff] %v444_v43 }
 0x1ec   : > { %v2043_v44 = vpop.f32.mrb[4].mxu1 }
 0x1ed   : > { %518 = vst [vmem:[%s3172_s25 + $0x28] sm:$0xff] %v2043_v44  ;;  %v454_v51 = vpop.f32.mrb[5].mxu1 }
 0x1ee   : > { %517 = vst [vmem:[%s3172_s25 + $0x20] sm:$0xff] %v454_v51 }
 0x1f0   : > { %v2046_v52 = vpop.f32.mrb[6].mxu1 }
 0x1f1   : > { %520 = vst [vmem:[%s3172_s25 + $0x38] sm:$0xff] %v2046_v52  ;;  %v464_v59 = vpop.f32.mrb[7].mxu1 }
 0x1f2   : > { %519 = vst [vmem:[%s3172_s25 + $0x30] sm:$0xff] %v464_v59 }
 0x1f4   : > { %v2049_v60 = vpop.f32.mrb[8].mxu1 }
 0x1f5   : > { %522 = vst [vmem:[%s3172_s25 + $0x48] sm:$0xff] %v2049_v60  ;;  %v474_v4 = vpop.f32.mrb[9].mxu1 }
 0x1f6   : > { %521 = vst [vmem:[%s3172_s25 + $0x40] sm:$0xff] %v474_v4 }
 0x1f8   : > { %v2052_v5 = vpop.f32.mrb[10].mxu1 }
 0x1f9   : > { %524 = vst [vmem:[%s3172_s25 + $0x58] sm:$0xff] %v2052_v5  ;;  %v484_v12 = vpop.f32.mrb[11].mxu1 }
 0x1fa   : > { %523 = vst [vmem:[%s3172_s25 + $0x50] sm:$0xff] %v484_v12 }
 0x1fc   : > { %v2055_v13 = vpop.f32.mrb[12].mxu1 }
 0x1fd   : > { %526 = vst [vmem:[%s3172_s25 + $0x68] sm:$0xff] %v2055_v13  ;;  %v494_v20 = vpop.f32.mrb[13].mxu1 }
 0x1fe   : > { %525 = vst [vmem:[%s3172_s25 + $0x60] sm:$0xff] %v494_v20 }
 0x200   : > { %v2058_v21 = vpop.f32.mrb[14].mxu1 }
 0x201   : > { %528 = vst [vmem:[%s3172_s25 + $0x78] sm:$0xff] %v2058_v21  ;;  %v504_v26 = vpop.f32.mrb[15].mxu1 }
 0x202   : > { %527 = vst [vmem:[%s3172_s25 + $0x70] sm:$0xff] %v504_v26 }
 0x204   : > { %v2149_v35 = vpop.f32.mrb[16].mxu1 }
 0x205   : > { %1603 = vst [vmem:[%s3172_s25 + $0x88] sm:$0xff] %v2149_v35  ;;  %v757_v37 = vpop.f32.mrb[17].mxu1 }
 0x206   : > { %1602 = vst [vmem:[%s3172_s25 + $0x80] sm:$0xff] %v757_v37 }
 0x208   : > { %v2152_v38 = vpop.f32.mrb[18].mxu1 }
 0x209   : > { %1605 = vst [vmem:[%s3172_s25 + $0x98] sm:$0xff] %v2152_v38  ;;  %v767_v40 = vpop.f32.mrb[19].mxu1 }
 0x20a   : > { %1604 = vst [vmem:[%s3172_s25 + $0x90] sm:$0xff] %v767_v40 }
 0x20c   : > { %v2155_v41 = vpop.f32.mrb[20].mxu1 }
 0x20d   : > { %1607 = vst [vmem:[%s3172_s25 + $0xa8] sm:$0xff] %v2155_v41  ;;  %v777_v42 = vpop.f32.mrb[21].mxu1 }
 0x20e   : > { %1606 = vst [vmem:[%s3172_s25 + $0xa0] sm:$0xff] %v777_v42 }
 0x210   : > { %v2158_v45 = vpop.f32.mrb[22].mxu1 }
 0x211   : > { %1609 = vst [vmem:[%s3172_s25 + $0xb8] sm:$0xff] %v2158_v45  ;;  %v787_v46 = vpop.f32.mrb[23].mxu1 }
 0x212   : > { %1608 = vst [vmem:[%s3172_s25 + $0xb0] sm:$0xff] %v787_v46 }
 0x214   : > { %v2161_v48 = vpop.f32.mrb[24].mxu1 }
 0x215   : > { %1611 = vst [vmem:[%s3172_s25 + $0xc8] sm:$0xff] %v2161_v48  ;;  %v797_v49 = vpop.f32.mrb[25].mxu1 }
 0x216   : > { %1610 = vst [vmem:[%s3172_s25 + $0xc0] sm:$0xff] %v797_v49 }
 0x218   : > { %v2164_v50 = vpop.f32.mrb[26].mxu1 }
 0x219   : > { %1613 = vst [vmem:[%s3172_s25 + $0xd8] sm:$0xff] %v2164_v50  ;;  %v807_v53 = vpop.f32.mrb[27].mxu1 }
 0x21a   : > { %1612 = vst [vmem:[%s3172_s25 + $0xd0] sm:$0xff] %v807_v53 }
 0x21c   : > { %v2167_v54 = vpop.f32.mrb[28].mxu1 }
 0x21d   : > { %1615 = vst [vmem:[%s3172_s25 + $0xe8] sm:$0xff] %v2167_v54  ;;  %v817_v56 = vpop.f32.mrb[29].mxu1 }
 0x21e   : > { %1614 = vst [vmem:[%s3172_s25 + $0xe0] sm:$0xff] %v817_v56 }
 0x220   : > { %v2170_v57 = vpop.f32.mrb[30].mxu1 }
 0x221   : > { %1617 = vst [vmem:[%s3172_s25 + $0xf8] sm:$0xff] %v2170_v57  ;;  %v827_v58 = vpop.f32.mrb[31].mxu1 }
 0x222   : > { %1616 = vst [vmem:[%s3172_s25 + $0xf0] sm:$0xff] %v827_v58 }
 0x224   : > { %v2261_v61 = vpop.f32.mrb[32].mxu1 }
 0x225   : > { %1635 = vst [vmem:[%s3172_s25 + $0x108] sm:$0xff] %v2261_v61  ;;  %v1081_v62 = vpop.f32.mrb[33].mxu1 }
 0x226   : > { %1634 = vst [vmem:[%s3172_s25 + $0x100] sm:$0xff] %v1081_v62 }
 0x228   : > { %v2264_v1 = vpop.f32.mrb[34].mxu1 }
 0x229   : > { %1637 = vst [vmem:[%s3172_s25 + $0x118] sm:$0xff] %v2264_v1  ;;  %v1091_v2 = vpop.f32.mrb[35].mxu1 }
 0x22a   : > { %1636 = vst [vmem:[%s3172_s25 + $0x110] sm:$0xff] %v1091_v2 }
 0x22c   : > { %v2267_v3 = vpop.f32.mrb[36].mxu1 }
 0x22d   : > { %1639 = vst [vmem:[%s3172_s25 + $0x128] sm:$0xff] %v2267_v3  ;;  %v1101_v6 = vpop.f32.mrb[37].mxu1 }
 0x22e   : > { %1638 = vst [vmem:[%s3172_s25 + $0x120] sm:$0xff] %v1101_v6 }
 0x230   : > { %v2270_v7 = vpop.f32.mrb[38].mxu1 }
 0x231   : > { %1641 = vst [vmem:[%s3172_s25 + $0x138] sm:$0xff] %v2270_v7  ;;  %v1111_v9 = vpop.f32.mrb[39].mxu1 }
 0x232   : > { %1640 = vst [vmem:[%s3172_s25 + $0x130] sm:$0xff] %v1111_v9 }
 0x234   : > { %v2273_v34 = vpop.f32.mrb[40].mxu1 }
 0x235   : > { %1643 = vst [vmem:[%s3172_s25 + $0x148] sm:$0xff] %v2273_v34  ;;  %v1121_v10 = vpop.f32.mrb[41].mxu1 }
 0x236   : > { %1642 = vst [vmem:[%s3172_s25 + $0x140] sm:$0xff] %v1121_v10 }
 0x238   : > { %v2276_v39 = vpop.f32.mrb[42].mxu1 }
 0x239   : > { %1645 = vst [vmem:[%s3172_s25 + $0x158] sm:$0xff] %v2276_v39  ;;  %v1131_v11 = vpop.f32.mrb[43].mxu1 }
 0x23a   : > { %1644 = vst [vmem:[%s3172_s25 + $0x150] sm:$0xff] %v1131_v11 }
 0x23c   : > { %v2279_v47 = vpop.f32.mrb[44].mxu1 }
 0x23d   : > { %1647 = vst [vmem:[%s3172_s25 + $0x168] sm:$0xff] %v2279_v47  ;;  %v1141_v14 = vpop.f32.mrb[45].mxu1 }
 0x23e   : > { %1646 = vst [vmem:[%s3172_s25 + $0x160] sm:$0xff] %v1141_v14 }
 0x240   : > { %v2282_v55 = vpop.f32.mrb[46].mxu1 }
 0x241   : > { %1649 = vst [vmem:[%s3172_s25 + $0x178] sm:$0xff] %v2282_v55  ;;  %v1151_v15 = vpop.f32.mrb[47].mxu1 }
 0x242   : > { %1648 = vst [vmem:[%s3172_s25 + $0x170] sm:$0xff] %v1151_v15 }
 0x244   : > { %v2373_v63 = vpop.f32.mrb[48].mxu1 }
 0x245   : > { %1667 = vst [vmem:[%s3172_s25 + $0x188] sm:$0xff] %v2373_v63  ;;  %v1405_v17 = vpop.f32.mrb[49].mxu1 }
 0x246   : > { %1666 = vst [vmem:[%s3172_s25 + $0x180] sm:$0xff] %v1405_v17 }
 0x248   : > { %v2376_v8 = vpop.f32.mrb[50].mxu1 }
 0x249   : > { %1669 = vst [vmem:[%s3172_s25 + $0x198] sm:$0xff] %v2376_v8  ;;  %v1415_v18 = vpop.f32.mrb[51].mxu1 }
 0x24a   : > { %1668 = vst [vmem:[%s3172_s25 + $0x190] sm:$0xff] %v1415_v18 }
 0x24c   : > { %v2379_v19 = vpop.f32.mrb[52].mxu1 }
 0x24d   : > { %1671 = vst [vmem:[%s3172_s25 + $0x1a8] sm:$0xff] %v2379_v19  ;;  %v1425_v22 = vpop.f32.mrb[53].mxu1 }
 0x24e   : > { %1670 = vst [vmem:[%s3172_s25 + $0x1a0] sm:$0xff] %v1425_v22 }
 0x250   : > { %v2382_v16 = vpop.f32.mrb[54].mxu1 }
 0x251   : > { %1673 = vst [vmem:[%s3172_s25 + $0x1b8] sm:$0xff] %v2382_v16  ;;  %v1435_v24 = vpop.f32.mrb[55].mxu1 }
 0x252   : > { %1672 = vst [vmem:[%s3172_s25 + $0x1b0] sm:$0xff] %v1435_v24 }
 0x254   : > { %v2385_v25 = vpop.f32.mrb[56].mxu1 }
 0x255   : > { %1675 = vst [vmem:[%s3172_s25 + $0x1c8] sm:$0xff] %v2385_v25  ;;  %v1445_v27 = vpop.f32.mrb[57].mxu1 }
 0x256   : > { %1674 = vst [vmem:[%s3172_s25 + $0x1c0] sm:$0xff] %v1445_v27 }
 0x258   : > { %v2388_v23 = vpop.f32.mrb[58].mxu1 }
 0x259   : > { %1677 = vst [vmem:[%s3172_s25 + $0x1d8] sm:$0xff] %v2388_v23  ;;  %v1455_v28 = vpop.f32.mrb[59].mxu1 }
 0x25a   : > { %1676 = vst [vmem:[%s3172_s25 + $0x1d0] sm:$0xff] %v1455_v28 }
 0x25c   : > { %v2391_v29 = vpop.f32.mrb[60].mxu1 }
 0x25d   : > { %1679 = vst [vmem:[%s3172_s25 + $0x1e8] sm:$0xff] %v2391_v29  ;;  %v1465_v30 = vpop.f32.mrb[61].mxu1 }
 0x25e   : > { %1678 = vst [vmem:[%s3172_s25 + $0x1e0] sm:$0xff] %v1465_v30 }
 0x260   : > { %v2394_v31 = vpop.f32.mrb[62].mxu1 }
 0x261   : > { %1681 = vst [vmem:[%s3172_s25 + $0x1f8] sm:$0xff] %v2394_v31  ;;  %v1475_v32 = vpop.f32.mrb[63].mxu1 }
 0x262   : > { %1680 = vst [vmem:[%s3172_s25 + $0x1f0] sm:$0xff] %v1475_v32 }
 0x263   : > { %2705 = shalt.err (!%p2702_p3)
}
 0x264   : > { %s2706_s9 = scalar_lea.hbm %s3241_s4, 8192  ;;  %s2710_s17 = scalar_lea.hbm %s3293_s3, 16384 }
 0x265   : > { %p2707_p4 = scmp.ne.s32.totalorder %s3241_s4, %s2706_s9  ;;  %p2711_p9 = scmp.lt.u32.totalorder %s3241_s4, %s3293_s3 }
 0x266   : > { %p2712_p10 = scmp.lt.u32.totalorder %s2710_s17, %s2706_s9  ;;  %p2714_p12 = scmp.lt.u32.totalorder %s2706_s9, %s3241_s4 }
 0x267   : > { %p2708_p7 = pnand %p2707_p4, %p2817_p5 }
 0x268   : > { %p2713_p11 = por %p2712_p10, %p2711_p9 }
 0x269   : > { %p2709_p8 = pneg %p2708_p7 }
 0x26a   : > { %p2715_p13 = por %p2714_p12, %p2713_p11 }
 0x26c   : > { %p2716_p0 = pnand %p2715_p13, %p2709_p8 }
 0x26e   : > { %2719 = shalt.err (!%p2716_p0)
}
 0x26f   : > { %s2757_s30 = smov 128   ;;  %s2758_s24 = smov 8  }
 0x270   : > { %2651 = dma.vmem_to_hbm [thread:$0]  (%p2817_p5), %s3243_s27, 8192, %s3241_s4, %s3249_s16, %s2757_s30, %s2757_s30, %s2758_s24  }
 0x271 PF: > { %p2657_p1 = scmp.ge.s32.totalorder %s2754_s15, 2  ;;  %s1531_s25 = sand.u32 1, %s2742_s12  }
 0x272   : > { %s1532_s26 = scalar_lea.sflag [#allocation3], %s1531_s25 }
 0x273   : > { %p2654_p2 = pnand %p2657_p1, %p2821_p6 }
 0x275   : > { %2737 = dma.done.wait (!%p2654_p2), %s1532_s26, 8192  }
 0x276   : > { %2739 = vsyncadd (!%p2654_p2), %s1532_s26, 4294959104  ;;  %p13_p3 = scmp.ge.s32.totalorder %s2804_s18, 4   ;;  %s3296_s12 = smov %s2746_s13 }
 0x277   : > { %s3297_s13 = smov %s2750_s14  ;;  %s3298_s14 = smov %s2815_s21 }
 0x278   : > { %s3299_s15 = smov %s2804_s18  ;;  %15 = sbr.rel (!%p13_p3) target bundleno = 3 (0x3), region = 73 }
 0x27f   :  { %1537 = vsyncpa [#allocation3], 1 }
 0x280   :  { %1539 = vsyncpa [#allocation3 + $0x1], 1 }

</bundles_post_ra>
